<compile_context>
chip_gen: v7x
topology: tpu7x:2x2x1
jax: 0.10.0
libtpu: 0.0.40
codegen_flags: <defaults>
</compile_context>

<pallas_src>
import functools

import jax
import jax.numpy as jnp
from jax.experimental import pallas as pl
from jax.experimental.pallas import tpu as pltpu

HIDDEN_DIM = 32
NUM_STEPS = 3
NUM_NODES = 8          # number of "sentences" (graph nodes) per graph
NUM_EDGES = 16
NUM_GRAPHS = 4         # batch of graphs sharing the GGNN parameters


# ----------------------------------------------------------------------------
# Pallas kernel: one graph per grid step.  Builds the dense adjacency in-kernel
# and runs num_steps of (fused matmul + GRU cell).
# ----------------------------------------------------------------------------
def ggnn_kernel(x_ref, ei_ref, ew_ref, wf_ref, bias_ref, out_ref, *,
                num_steps: int, hidden_dim: int, num_nodes: int,
                num_edges: int):
    H = hidden_dim
    N = num_nodes
    E = num_edges

    h = x_ref[...]                                   # [N, H]  f32
    ei = ei_ref[...]                                 # [2, E]  i32  (row0=src, row1=dst)
    ew = ew_ref[...]                                 # [1, E]  f32

    # Dense adjacency built in-kernel (replaces the wrapper-side XLA scatter):
    #   A[d, s] = sum_e w[e] * [dst[e] == d] * [src[e] == s]
    node_iota = jax.lax.broadcasted_iota(jnp.int32, (N, E), 0)
    src_oh = (node_iota == ei[0:1, :]).astype(jnp.float32)      # [N, E]
    dst_oh = (node_iota == ei[1:2, :]).astype(jnp.float32)      # [N, E]
    adj = jax.lax.dot_general(dst_oh * ew, src_oh,
                              (((1,), (1,)), ((), ())),
                              preferred_element_type=jnp.float32)  # [N, N]

    # Step-invariant bias loads (hoisted: JAX does not CSE across the unroll).
    bias = bias_ref[...]                             # [1, 4H]
    b_r = bias[:, 0 * H:1 * H]                       # b_ih_r + b_hh_r (pre-summed)
    b_z = bias[:, 1 * H:2 * H]                       # b_ih_z + b_hh_z (pre-summed)
    b_in = bias[:, 2 * H:3 * H]                      # b_ih_n
    b_hn = bias[:, 3 * H:4 * H]                      # b_hh_n

    for step in range(num_steps):                    # small, static unroll
        wf = wf_ref[step]                            # [H, 6H] = [Wc[step] | W_hh_all]

        # One fused h-projection feeds both the A-aggregated input gates and
        # the hidden gates -> exactly 2 MXU matmuls per step.
        g = jnp.dot(h, wf, preferred_element_type=jnp.float32)          # [N, 6H]
        i_gates = jnp.dot(adj, g[:, :3 * H],
                          preferred_element_type=jnp.float32)           # [N, 3H]
        h_gates = g[:, 3 * H:]                                          # [N, 3H]

        # Gate order matches PyTorch GRUCell: r, z, n.
        r = jax.nn.sigmoid(i_gates[:, :H] + h_gates[:, :H] + b_r)
        z = jax.nn.sigmoid(i_gates[:, H:2 * H] + h_gates[:, H:2 * H] + b_z)
        n = jnp.tanh(i_gates[:, 2 * H:] + b_in + r * (h_gates[:, 2 * H:] + b_hn))
        h = (1.0 - z) * n + z * h

    out_ref[...] = h


# ----------------------------------------------------------------------------
# Wrapper: fold/fuse weights, batch graphs onto a "parallel" grid axis.
# ----------------------------------------------------------------------------
def sentence_graph_prop(x, edge_index, edge_weight, params,
                        num_steps: int = NUM_STEPS):
    """Batched GGNN propagation.

    x:           [B, N, H] f32
    edge_index:  [B, 2, E] int   (row 0 = src, row 1 = dst; source_to_target)
    edge_weight: [B, E]    f32
    """
    b, n, hd = x.shape
    e = edge_weight.shape[-1]

    # Fuse GRU gates along the output axis (gate order r, z, n): [H, 3H].
    w_ih_all = jnp.concatenate([params["w_ih_t"][i] for i in range(3)], axis=1)
    w_hh_all = jnp.concatenate([params["w_hh_t"][i] for i in range(3)], axis=1)

    # Fold the per-step GGNN weight into the fused input-gate projection and
    # concatenate with the hidden-gate projection so the kernel does ONE
    # h-matmul per step:  wfused[s] = [ W[s] @ W_ih_all | W_hh_all ]  [S,H,6H].
    wc = jnp.einsum("shk,kg->shg", params["w"], w_ih_all,
                    precision=jax.lax.Precision.HIGHEST)             # [S, H, 3H]
    w_hh_b = jnp.broadcast_to(w_hh_all[None], (num_steps, hd, 3 * hd))
    wfused = jnp.concatenate([wc, w_hh_b], axis=2)                   # [S, H, 6H]

    # Pre-sum r/z biases; keep the two n-biases separate (b_hh_n must sit
    # inside the r-multiply).  Single [1, 4H] bias operand.
    bias = jnp.concatenate(
        [params["b_ih"][0] + params["b_hh"][0],
         params["b_ih"][1] + params["b_hh"][1],
         params["b_ih"][2],
         params["b_hh"][2]], axis=1)                                 # [1, 4H]

    edge_index = edge_index.astype(jnp.int32)                        # [B, 2, E]
    edge_weight = edge_weight.reshape(b, 1, e).astype(jnp.float32)   # [B, 1, E]

    # Advisory cost estimate for the whole call.
    g3 = 3 * hd
    flops_per_graph = (2 * n * e * n                       # adjacency build
                       + num_steps * (2 * n * hd * 6 * hd  # h @ wfused
                                      + 2 * n * n * g3     # A @ (.)
                                      + 14 * n * hd))      # gates / blend
    cost = pl.CostEstimate(
        flops=b * flops_per_graph,
        transcendentals=b * num_steps * 3 * n * hd,
        bytes_accessed=4 * (b * (2 * n * hd + 3 * e)
                            + num_steps * hd * 6 * hd + 4 * hd),
    )

    kernel = functools.partial(ggnn_kernel, num_steps=num_steps,
                               hidden_dim=hd, num_nodes=n, num_edges=e)

    return pl.pallas_call(
        kernel,
        out_shape=jax.ShapeDtypeStruct((b, n, hd), jnp.float32),
        grid=(b,),
        in_specs=[
            pl.BlockSpec((None, n, hd), lambda i: (i, 0, 0)),            # x (per graph)
            pl.BlockSpec((None, 2, e), lambda i: (i, 0, 0)),             # edge_index
            pl.BlockSpec((None, 1, e), lambda i: (i, 0, 0)),             # edge_weight
            pl.BlockSpec((num_steps, hd, 6 * hd), lambda i: (0, 0, 0)),  # wfused (shared)
            pl.BlockSpec((1, 4 * hd), lambda i: (0, 0)),                 # bias   (shared)
        ],
        out_specs=pl.BlockSpec((None, n, hd), lambda i: (i, 0, 0)),
        compiler_params=pltpu.CompilerParams(
            dimension_semantics=("parallel",)),
        cost_estimate=cost,
    )(x, edge_index, edge_weight, wfused, bias)


# ----------------------------------------------------------------------------
# Pure-JAX per-graph reference (original unfused math + scatter) for checking.
# ----------------------------------------------------------------------------
def sentence_graph_prop_ref(x, edge_index, edge_weight, params,
                            num_steps: int = NUM_STEPS):
    n, hd = x.shape
    src, dst = edge_index[0], edge_index[1]
    adj = jnp.zeros((n, n), jnp.float32).at[dst, src].add(edge_weight)
    h = x
    for step in range(num_steps):
        m = h @ params["w"][step]
        m = adj @ m
        i_r = m @ params["w_ih_t"][0] + params["b_ih"][0]
        i_z = m @ params["w_ih_t"][1] + params["b_ih"][1]
        i_n = m @ params["w_ih_t"][2] + params["b_ih"][2]
        h_r = h @ params["w_hh_t"][0] + params["b_hh"][0]
        h_z = h @ params["w_hh_t"][1] + params["b_hh"][1]
        h_n = h @ params["w_hh_t"][2] + params["b_hh"][2]
        r = jax.nn.sigmoid(i_r + h_r)
        z = jax.nn.sigmoid(i_z + h_z)
        nn_ = jnp.tanh(i_n + r * h_n)
        h = (1.0 - z) * nn_ + z * h
    return h


# ----------------------------------------------------------------------------
# Deterministic parameter initialization (shapes from GatedGraphConv + GRUCell).
# ----------------------------------------------------------------------------
def init_params(key, hidden_dim: int, num_steps: int):
    k = jax.random.split(key, 5)
    bound = 1.0 / jnp.sqrt(hidden_dim)
    # GatedGraphConv per-step weights: [num_steps, H, H]
    w = jax.random.uniform(k[0], (num_steps, hidden_dim, hidden_dim),
                           jnp.float32, -bound, bound)
    # GRUCell weights (PyTorch weight_ih/hh [3H, H]) stored pre-transposed and
    # split per gate: [3, H, H] so the math is m @ W_i* / h @ W_h*.
    w_ih_t = jax.random.uniform(k[1], (3, hidden_dim, hidden_dim),
                                jnp.float32, -bound, bound)
    w_hh_t = jax.random.uniform(k[2], (3, hidden_dim, hidden_dim),
                                jnp.float32, -bound, bound)
    # Biases: [3, 1, H] so they broadcast over nodes.
    b_ih = jax.random.uniform(k[3], (3, 1, hidden_dim),
                              jnp.float32, -bound, bound)
    b_hh = jax.random.uniform(k[4], (3, 1, hidden_dim),
                              jnp.float32, -bound, bound)
    return {"w": w, "w_ih_t": w_ih_t, "w_hh_t": w_hh_t,
            "b_ih": b_ih, "b_hh": b_hh}


if __name__ == "__main__":
    key = jax.random.PRNGKey(0)
    k_x, k_p, k_src, k_dst, k_w = jax.random.split(key, 5)

    x = jax.random.normal(k_x, (NUM_GRAPHS, NUM_NODES, HIDDEN_DIM), jnp.float32)
    params = init_params(k_p, HIDDEN_DIM, NUM_STEPS)

    # Deterministic random batch of graphs: E directed weighted edges each.
    src = jax.random.randint(k_src, (NUM_GRAPHS, NUM_EDGES), 0, NUM_NODES,
                             jnp.int32)
    dst = jax.random.randint(k_dst, (NUM_GRAPHS, NUM_EDGES), 0, NUM_NODES,
                             jnp.int32)
    edge_index = jnp.stack([src, dst], axis=1)                      # [B, 2, E]
    edge_weight = jax.random.uniform(k_w, (NUM_GRAPHS, NUM_EDGES), jnp.float32)

    out = sentence_graph_prop(x, edge_index, edge_weight, params)
    out = jax.block_until_ready(out)

    ref = jnp.stack([
        sentence_graph_prop_ref(x[g], edge_index[g], edge_weight[g], params)
        for g in range(NUM_GRAPHS)])

    assert out.shape == (NUM_GRAPHS, NUM_NODES, HIDDEN_DIM)
    # Tolerance slightly relaxed: the W[step] @ W_ih fold and the in-kernel
    # adjacency matmul change f32 summation order vs. the unfused reference.
    assert jnp.allclose(out, ref, atol=1e-4, rtol=1e-4), (
        float(jnp.max(jnp.abs(out - ref))))

    print("KERNEL_OK")
</pallas_src>

<mosaic_0001>
module attributes {stable_mosaic.version = 11 : i64} {
  func.func @ggnn_kernel(%arg0: i32, %arg1: memref<1x8x32xf32, #tpu.memory_space<vmem>>, %arg2: memref<1x2x16xi32, #tpu.memory_space<vmem>>, %arg3: memref<1x1x16xf32, #tpu.memory_space<vmem>>, %arg4: memref<3x32x192xf32, #tpu.memory_space<vmem>>, %arg5: memref<1x128xf32, #tpu.memory_space<vmem>>, %arg6: memref<1x8x32xf32, #tpu.memory_space<vmem>>) attributes {dimension_semantics = [#tpu.dimension_semantics<parallel>], iteration_bounds = array<i64: 4>, scalar_prefetch = 0 : i64, scratch_operands = 0 : i64, tpu.core_type = #tpu.core_type<tc>, window_params = [{transform_indices = @transform_0, window_bounds = array<i64: 1, 8, 32>}, {transform_indices = @transform_1, window_bounds = array<i64: 1, 2, 16>}, {transform_indices = @transform_2, window_bounds = array<i64: 1, 1, 16>}, {pipeline_mode = #tpu.pipeline_mode<synchronous>, transform_indices = @transform_3, window_bounds = array<i64: 3, 32, 192>}, {pipeline_mode = #tpu.pipeline_mode<synchronous>, transform_indices = @transform_4, window_bounds = array<i64: 1, 128>}, {transform_indices = @transform_5, window_bounds = array<i64: 1, 8, 32>}]} {
    %c0 = arith.constant 0 : index
    %c0_0 = arith.constant 0 : index
    %c0_1 = arith.constant 0 : index
    %0 = vector.load %arg1[%c0, %c0_0, %c0_1] : memref<1x8x32xf32, #tpu.memory_space<vmem>>, vector<1x8x32xf32>
    %1 = vector.shape_cast %0 : vector<1x8x32xf32> to vector<8x32xf32>
    %c0_2 = arith.constant 0 : index
    %c0_3 = arith.constant 0 : index
    %c0_4 = arith.constant 0 : index
    %2 = vector.load %arg2[%c0_2, %c0_3, %c0_4] : memref<1x2x16xi32, #tpu.memory_space<vmem>>, vector<1x2x16xi32>
    %3 = vector.shape_cast %2 : vector<1x2x16xi32> to vector<2x16xi32>
    %c0_5 = arith.constant 0 : index
    %c0_6 = arith.constant 0 : index
    %c0_7 = arith.constant 0 : index
    %4 = vector.load %arg3[%c0_5, %c0_6, %c0_7] : memref<1x1x16xf32, #tpu.memory_space<vmem>>, vector<1x1x16xf32>
    %5 = vector.shape_cast %4 : vector<1x1x16xf32> to vector<1x16xf32>
    %6 = tpu.iota {dimensions = array<i32: 0>} : vector<8x16xi32>
    %7 = vector.extract_strided_slice %3 {offsets = [0, 0], sizes = [1, 16], strides = [1, 1]} : vector<2x16xi32> to vector<1x16xi32>
    %8 = vector.broadcast %7 : vector<1x16xi32> to vector<8x16xi32>
    %9 = arith.cmpi eq, %6, %8 : vector<8x16xi32>
    %10 = arith.extui %9 : vector<8x16xi1> to vector<8x16xi32>
    %11 = arith.sitofp %10 : vector<8x16xi32> to vector<8x16xf32>
    %12 = vector.extract_strided_slice %3 {offsets = [1, 0], sizes = [1, 16], strides = [1, 1]} : vector<2x16xi32> to vector<1x16xi32>
    %13 = vector.broadcast %12 : vector<1x16xi32> to vector<8x16xi32>
    %14 = arith.cmpi eq, %6, %13 : vector<8x16xi32>
    %15 = arith.extui %14 : vector<8x16xi1> to vector<8x16xi32>
    %16 = arith.sitofp %15 : vector<8x16xi32> to vector<8x16xf32>
    %17 = vector.broadcast %5 : vector<1x16xf32> to vector<8x16xf32>
    %18 = arith.mulf %16, %17 : vector<8x16xf32>
    %cst = arith.constant dense<0.000000e+00> : vector<8x8xf32>
    %19 = tpu.matmul %18, %11, %cst {dimension_numbers = #tpu.dot_dimension_numbers<[1], [1], [0], [0], [0, 0, 1, 0], [], []>} : vector<8x16xf32>, vector<8x16xf32>, vector<8x8xf32> -> vector<8x8xf32>
    %c0_8 = arith.constant 0 : index
    %c0_9 = arith.constant 0 : index
    %20 = vector.load %arg5[%c0_8, %c0_9] : memref<1x128xf32, #tpu.memory_space<vmem>>, vector<1x128xf32>
    %21 = vector.extract_strided_slice %20 {offsets = [0, 0], sizes = [1, 32], strides = [1, 1]} : vector<1x128xf32> to vector<1x32xf32>
    %22 = vector.extract_strided_slice %20 {offsets = [0, 32], sizes = [1, 32], strides = [1, 1]} : vector<1x128xf32> to vector<1x32xf32>
    %23 = vector.extract_strided_slice %20 {offsets = [0, 64], sizes = [1, 32], strides = [1, 1]} : vector<1x128xf32> to vector<1x32xf32>
    %24 = vector.extract_strided_slice %20 {offsets = [0, 96], sizes = [1, 32], strides = [1, 1]} : vector<1x128xf32> to vector<1x32xf32>
    %c0_10 = arith.constant 0 : index
    %c0_11 = arith.constant 0 : index
    %c0_12 = arith.constant 0 : index
    %25 = vector.load %arg4[%c0_10, %c0_11, %c0_12] : memref<3x32x192xf32, #tpu.memory_space<vmem>>, vector<1x32x192xf32>
    %26 = vector.shape_cast %25 : vector<1x32x192xf32> to vector<32x192xf32>
    %cst_13 = arith.constant dense<0.000000e+00> : vector<8x192xf32>
    %27 = tpu.matmul %1, %26, %cst_13 {dimension_numbers = #tpu.dot_dimension_numbers<[1], [0], [0], [1], [0, 0, 1, 1], [], []>} : vector<8x32xf32>, vector<32x192xf32>, vector<8x192xf32> -> vector<8x192xf32>
    %28 = vector.extract_strided_slice %27 {offsets = [0, 0], sizes = [8, 96], strides = [1, 1]} : vector<8x192xf32> to vector<8x96xf32>
    %cst_14 = arith.constant dense<0.000000e+00> : vector<8x96xf32>
    %29 = tpu.matmul %19, %28, %cst_14 {dimension_numbers = #tpu.dot_dimension_numbers<[1], [0], [0], [1], [0, 0, 1, 1], [], []>} : vector<8x8xf32>, vector<8x96xf32>, vector<8x96xf32> -> vector<8x96xf32>
    %30 = vector.extract_strided_slice %27 {offsets = [0, 96], sizes = [8, 96], strides = [1, 1]} : vector<8x192xf32> to vector<8x96xf32>
    %31 = vector.extract_strided_slice %29 {offsets = [0, 0], sizes = [8, 32], strides = [1, 1]} : vector<8x96xf32> to vector<8x32xf32>
    %32 = vector.extract_strided_slice %30 {offsets = [0, 0], sizes = [8, 32], strides = [1, 1]} : vector<8x96xf32> to vector<8x32xf32>
    %33 = arith.addf %31, %32 : vector<8x32xf32>
    %34 = vector.broadcast %21 : vector<1x32xf32> to vector<8x32xf32>
    %35 = arith.addf %33, %34 : vector<8x32xf32>
    %36 = arith.negf %35 : vector<8x32xf32>
    %37 = math.exp %36 : vector<8x32xf32>
    %cst_15 = arith.constant 1.000000e+00 : f32
    %38 = vector.broadcast %cst_15 : f32 to vector<8x32xf32>
    %39 = arith.addf %38, %37 : vector<8x32xf32>
    %40 = arith.divf %38, %39 : vector<8x32xf32>
    %41 = vector.extract_strided_slice %29 {offsets = [0, 32], sizes = [8, 32], strides = [1, 1]} : vector<8x96xf32> to vector<8x32xf32>
    %42 = vector.extract_strided_slice %30 {offsets = [0, 32], sizes = [8, 32], strides = [1, 1]} : vector<8x96xf32> to vector<8x32xf32>
    %43 = arith.addf %41, %42 : vector<8x32xf32>
    %44 = vector.broadcast %22 : vector<1x32xf32> to vector<8x32xf32>
    %45 = arith.addf %43, %44 : vector<8x32xf32>
    %46 = arith.negf %45 : vector<8x32xf32>
    %47 = math.exp %46 : vector<8x32xf32>
    %cst_16 = arith.constant 1.000000e+00 : f32
    %48 = vector.broadcast %cst_16 : f32 to vector<8x32xf32>
    %49 = arith.addf %48, %47 : vector<8x32xf32>
    %50 = arith.divf %48, %49 : vector<8x32xf32>
    %51 = vector.extract_strided_slice %29 {offsets = [0, 64], sizes = [8, 32], strides = [1, 1]} : vector<8x96xf32> to vector<8x32xf32>
    %52 = vector.broadcast %23 : vector<1x32xf32> to vector<8x32xf32>
    %53 = arith.addf %51, %52 : vector<8x32xf32>
    %54 = vector.extract_strided_slice %30 {offsets = [0, 64], sizes = [8, 32], strides = [1, 1]} : vector<8x96xf32> to vector<8x32xf32>
    %55 = vector.broadcast %24 : vector<1x32xf32> to vector<8x32xf32>
    %56 = arith.addf %54, %55 : vector<8x32xf32>
    %57 = arith.mulf %40, %56 : vector<8x32xf32>
    %58 = arith.addf %53, %57 : vector<8x32xf32>
    %59 = math.tanh %58 : vector<8x32xf32>
    %cst_17 = arith.constant 1.000000e+00 : f32
    %60 = vector.broadcast %cst_17 : f32 to vector<8x32xf32>
    %61 = arith.subf %60, %50 : vector<8x32xf32>
    %62 = arith.mulf %61, %59 : vector<8x32xf32>
    %63 = arith.mulf %50, %1 : vector<8x32xf32>
    %64 = arith.addf %62, %63 : vector<8x32xf32>
    %c1 = arith.constant 1 : index
    %c0_18 = arith.constant 0 : index
    %c0_19 = arith.constant 0 : index
    %65 = vector.load %arg4[%c1, %c0_18, %c0_19] : memref<3x32x192xf32, #tpu.memory_space<vmem>>, vector<1x32x192xf32>
    %66 = vector.shape_cast %65 : vector<1x32x192xf32> to vector<32x192xf32>
    %cst_20 = arith.constant dense<0.000000e+00> : vector<8x192xf32>
    %67 = tpu.matmul %64, %66, %cst_20 {dimension_numbers = #tpu.dot_dimension_numbers<[1], [0], [0], [1], [0, 0, 1, 1], [], []>} : vector<8x32xf32>, vector<32x192xf32>, vector<8x192xf32> -> vector<8x192xf32>
    %68 = vector.extract_strided_slice %67 {offsets = [0, 0], sizes = [8, 96], strides = [1, 1]} : vector<8x192xf32> to vector<8x96xf32>
    %cst_21 = arith.constant dense<0.000000e+00> : vector<8x96xf32>
    %69 = tpu.matmul %19, %68, %cst_21 {dimension_numbers = #tpu.dot_dimension_numbers<[1], [0], [0], [1], [0, 0, 1, 1], [], []>} : vector<8x8xf32>, vector<8x96xf32>, vector<8x96xf32> -> vector<8x96xf32>
    %70 = vector.extract_strided_slice %67 {offsets = [0, 96], sizes = [8, 96], strides = [1, 1]} : vector<8x192xf32> to vector<8x96xf32>
    %71 = vector.extract_strided_slice %69 {offsets = [0, 0], sizes = [8, 32], strides = [1, 1]} : vector<8x96xf32> to vector<8x32xf32>
    %72 = vector.extract_strided_slice %70 {offsets = [0, 0], sizes = [8, 32], strides = [1, 1]} : vector<8x96xf32> to vector<8x32xf32>
    %73 = arith.addf %71, %72 : vector<8x32xf32>
    %74 = vector.broadcast %21 : vector<1x32xf32> to vector<8x32xf32>
    %75 = arith.addf %73, %74 : vector<8x32xf32>
    %76 = arith.negf %75 : vector<8x32xf32>
    %77 = math.exp %76 : vector<8x32xf32>
    %cst_22 = arith.constant 1.000000e+00 : f32
    %78 = vector.broadcast %cst_22 : f32 to vector<8x32xf32>
    %79 = arith.addf %78, %77 : vector<8x32xf32>
    %80 = arith.divf %78, %79 : vector<8x32xf32>
    %81 = vector.extract_strided_slice %69 {offsets = [0, 32], sizes = [8, 32], strides = [1, 1]} : vector<8x96xf32> to vector<8x32xf32>
    %82 = vector.extract_strided_slice %70 {offsets = [0, 32], sizes = [8, 32], strides = [1, 1]} : vector<8x96xf32> to vector<8x32xf32>
    %83 = arith.addf %81, %82 : vector<8x32xf32>
    %84 = vector.broadcast %22 : vector<1x32xf32> to vector<8x32xf32>
    %85 = arith.addf %83, %84 : vector<8x32xf32>
    %86 = arith.negf %85 : vector<8x32xf32>
    %87 = math.exp %86 : vector<8x32xf32>
    %cst_23 = arith.constant 1.000000e+00 : f32
    %88 = vector.broadcast %cst_23 : f32 to vector<8x32xf32>
    %89 = arith.addf %88, %87 : vector<8x32xf32>
    %90 = arith.divf %88, %89 : vector<8x32xf32>
    %91 = vector.extract_strided_slice %69 {offsets = [0, 64], sizes = [8, 32], strides = [1, 1]} : vector<8x96xf32> to vector<8x32xf32>
    %92 = vector.broadcast %23 : vector<1x32xf32> to vector<8x32xf32>
    %93 = arith.addf %91, %92 : vector<8x32xf32>
    %94 = vector.extract_strided_slice %70 {offsets = [0, 64], sizes = [8, 32], strides = [1, 1]} : vector<8x96xf32> to vector<8x32xf32>
    %95 = vector.broadcast %24 : vector<1x32xf32> to vector<8x32xf32>
    %96 = arith.addf %94, %95 : vector<8x32xf32>
    %97 = arith.mulf %80, %96 : vector<8x32xf32>
    %98 = arith.addf %93, %97 : vector<8x32xf32>
    %99 = math.tanh %98 : vector<8x32xf32>
    %cst_24 = arith.constant 1.000000e+00 : f32
    %100 = vector.broadcast %cst_24 : f32 to vector<8x32xf32>
    %101 = arith.subf %100, %90 : vector<8x32xf32>
    %102 = arith.mulf %101, %99 : vector<8x32xf32>
    %103 = arith.mulf %90, %64 : vector<8x32xf32>
    %104 = arith.addf %102, %103 : vector<8x32xf32>
    %c2 = arith.constant 2 : index
    %c0_25 = arith.constant 0 : index
    %c0_26 = arith.constant 0 : index
    %105 = vector.load %arg4[%c2, %c0_25, %c0_26] : memref<3x32x192xf32, #tpu.memory_space<vmem>>, vector<1x32x192xf32>
    %106 = vector.shape_cast %105 : vector<1x32x192xf32> to vector<32x192xf32>
    %cst_27 = arith.constant dense<0.000000e+00> : vector<8x192xf32>
    %107 = tpu.matmul %104, %106, %cst_27 {dimension_numbers = #tpu.dot_dimension_numbers<[1], [0], [0], [1], [0, 0, 1, 1], [], []>} : vector<8x32xf32>, vector<32x192xf32>, vector<8x192xf32> -> vector<8x192xf32>
    %108 = vector.extract_strided_slice %107 {offsets = [0, 0], sizes = [8, 96], strides = [1, 1]} : vector<8x192xf32> to vector<8x96xf32>
    %cst_28 = arith.constant dense<0.000000e+00> : vector<8x96xf32>
    %109 = tpu.matmul %19, %108, %cst_28 {dimension_numbers = #tpu.dot_dimension_numbers<[1], [0], [0], [1], [0, 0, 1, 1], [], []>} : vector<8x8xf32>, vector<8x96xf32>, vector<8x96xf32> -> vector<8x96xf32>
    %110 = vector.extract_strided_slice %107 {offsets = [0, 96], sizes = [8, 96], strides = [1, 1]} : vector<8x192xf32> to vector<8x96xf32>
    %111 = vector.extract_strided_slice %109 {offsets = [0, 0], sizes = [8, 32], strides = [1, 1]} : vector<8x96xf32> to vector<8x32xf32>
    %112 = vector.extract_strided_slice %110 {offsets = [0, 0], sizes = [8, 32], strides = [1, 1]} : vector<8x96xf32> to vector<8x32xf32>
    %113 = arith.addf %111, %112 : vector<8x32xf32>
    %114 = vector.broadcast %21 : vector<1x32xf32> to vector<8x32xf32>
    %115 = arith.addf %113, %114 : vector<8x32xf32>
    %116 = arith.negf %115 : vector<8x32xf32>
    %117 = math.exp %116 : vector<8x32xf32>
    %cst_29 = arith.constant 1.000000e+00 : f32
    %118 = vector.broadcast %cst_29 : f32 to vector<8x32xf32>
    %119 = arith.addf %118, %117 : vector<8x32xf32>
    %120 = arith.divf %118, %119 : vector<8x32xf32>
    %121 = vector.extract_strided_slice %109 {offsets = [0, 32], sizes = [8, 32], strides = [1, 1]} : vector<8x96xf32> to vector<8x32xf32>
    %122 = vector.extract_strided_slice %110 {offsets = [0, 32], sizes = [8, 32], strides = [1, 1]} : vector<8x96xf32> to vector<8x32xf32>
    %123 = arith.addf %121, %122 : vector<8x32xf32>
    %124 = vector.broadcast %22 : vector<1x32xf32> to vector<8x32xf32>
    %125 = arith.addf %123, %124 : vector<8x32xf32>
    %126 = arith.negf %125 : vector<8x32xf32>
    %127 = math.exp %126 : vector<8x32xf32>
    %cst_30 = arith.constant 1.000000e+00 : f32
    %128 = vector.broadcast %cst_30 : f32 to vector<8x32xf32>
    %129 = arith.addf %128, %127 : vector<8x32xf32>
    %130 = arith.divf %128, %129 : vector<8x32xf32>
    %131 = vector.extract_strided_slice %109 {offsets = [0, 64], sizes = [8, 32], strides = [1, 1]} : vector<8x96xf32> to vector<8x32xf32>
    %132 = vector.broadcast %23 : vector<1x32xf32> to vector<8x32xf32>
    %133 = arith.addf %131, %132 : vector<8x32xf32>
    %134 = vector.extract_strided_slice %110 {offsets = [0, 64], sizes = [8, 32], strides = [1, 1]} : vector<8x96xf32> to vector<8x32xf32>
    %135 = vector.broadcast %24 : vector<1x32xf32> to vector<8x32xf32>
    %136 = arith.addf %134, %135 : vector<8x32xf32>
    %137 = arith.mulf %120, %136 : vector<8x32xf32>
    %138 = arith.addf %133, %137 : vector<8x32xf32>
    %139 = math.tanh %138 : vector<8x32xf32>
    %cst_31 = arith.constant 1.000000e+00 : f32
    %140 = vector.broadcast %cst_31 : f32 to vector<8x32xf32>
    %141 = arith.subf %140, %130 : vector<8x32xf32>
    %142 = arith.mulf %141, %139 : vector<8x32xf32>
    %143 = arith.mulf %130, %104 : vector<8x32xf32>
    %144 = arith.addf %142, %143 : vector<8x32xf32>
    %c0_32 = arith.constant 0 : index
    %c0_33 = arith.constant 0 : index
    %c0_34 = arith.constant 0 : index
    %145 = vector.load %arg6[%c0_32, %c0_33, %c0_34] : memref<1x8x32xf32, #tpu.memory_space<vmem>>, vector<1x8x32xf32>
    %146 = vector.shape_cast %145 : vector<1x8x32xf32> to vector<8x32xf32>
    %147 = vector.shape_cast %144 : vector<8x32xf32> to vector<1x8x32xf32>
    tpu.vector_store %arg6[%c0_32, %c0_33, %c0_34], %147 {strides = array<i32>} : memref<1x8x32xf32, #tpu.memory_space<vmem>>, vector<1x8x32xf32>,
    return
  }
  func.func @transform_0(%arg0: i32) -> (i32, i32, i32) {
    %c0_i32 = arith.constant 0 : i32
    %c0_i32_0 = arith.constant 0 : i32
    %c0_i32_1 = arith.constant 0 : i32
    return %arg0, %c0_i32, %c0_i32_0 : i32, i32, i32
  }
  func.func @transform_1(%arg0: i32) -> (i32, i32, i32) {
    %c0_i32 = arith.constant 0 : i32
    %c0_i32_0 = arith.constant 0 : i32
    %c0_i32_1 = arith.constant 0 : i32
    return %arg0, %c0_i32, %c0_i32_0 : i32, i32, i32
  }
  func.func @transform_2(%arg0: i32) -> (i32, i32, i32) {
    %c0_i32 = arith.constant 0 : i32
    %c0_i32_0 = arith.constant 0 : i32
    %c0_i32_1 = arith.constant 0 : i32
    return %arg0, %c0_i32, %c0_i32_0 : i32, i32, i32
  }
  func.func @transform_3(%arg0: i32) -> (i32, i32, i32) {
    %c0_i32 = arith.constant 0 : i32
    %c0_i32_0 = arith.constant 0 : i32
    %c0_i32_1 = arith.constant 0 : i32
    %c0_i32_2 = arith.constant 0 : i32
    return %c0_i32, %c0_i32_0, %c0_i32_1 : i32, i32, i32
  }
  func.func @transform_4(%arg0: i32) -> (i32, i32) {
    %c0_i32 = arith.constant 0 : i32
    %c0_i32_0 = arith.constant 0 : i32
    %c0_i32_1 = arith.constant 0 : i32
    return %c0_i32, %c0_i32_0 : i32, i32
  }
  func.func @transform_5(%arg0: i32) -> (i32, i32, i32) {
    %c0_i32 = arith.constant 0 : i32
    %c0_i32_0 = arith.constant 0 : i32
    %c0_i32_1 = arith.constant 0 : i32
    return %arg0, %c0_i32, %c0_i32_0 : i32, i32, i32
  }
}

</mosaic_0001>

<bundles_post_ra>
// kernel: tpu_custom_call.1
= control target key start
LH: loop header
LB: loop body
LE: loop exit
PB: predicated region body
PF: predicated region fallthrough
CT: control target
= control target key end

     0   :  { %s1853_s0 = inlined_call_operand.hbm [shape: f32[4,8,32], index: 0, kind: input, shape index: {}]   ;;  %s1854_s1 = inlined_call_operand.hbm [shape: s32[4,2,16], index: 1, kind: input, shape index: {}]   ;;  %s1855_s2 = inlined_call_operand.vmem [shape: f32[4,1,16], index: 2, kind: input, shape index: {}]   ;;  %s1856_s3 = inlined_call_operand.hbm [shape: f32[3,32,192], index: 3, kind: input, shape index: {}]   ;;  %s1857_s4 = inlined_call_operand.vmem [shape: f32[1,128], index: 4, kind: input, shape index: {}]   ;;  %s1858_s5 = inlined_call_operand.hbm [shape: f32[4,8,32], index: 5, kind: output, shape index: {}]  }
   0x1   :  { %1863 = sst [smem:[#allocation13_spill]] %s1853_s0 }
   0x2   :  { %10 = vsyncpa [#allocation3], 0 }
   0x3   :  { %12 = vsyncpa [#allocation3 + $0x1], 0 }
   0x4   :  { %13 = vsyncpa [#allocation6], 0 }
   0x5   :  { %15 = vsyncpa [#allocation6 + $0x1], 0 }
   0x6   :  { %16 = vsyncpa [#allocation4], 0 }
   0x7   :  { %18 = vsyncpa [#allocation4 + $0x1], 0  ;;  %s1544_s18 = smov 0   ;;  %s1546_s19 = smov 0  }
   0x8   :  { %s1548_s20 = smov 0   ;;  %s1550_s21 = smov 0  }
   0x9 LB: > { %s1565_s22 = sadd.s32 4294967295, %s1501_s21   ;;  %s1153_s23 = sadd.s32 4294967294, %s1501_s21   ;;  %s1501_s21 = sphi %s1550_s21, %s1881_s21   ;;  %s1497_s20 = sphi %s1548_s20, %s1880_s20   ;;  %s1493_s19 = sphi %s1546_s19, %s1879_s19   ;;  %s1489_s18 = sphi %s1544_s18, %s1878_s18  }
   0xa   : > { %p44_p0 = scmp.ne.s32.totalorder %s1493_s19, %s1489_s18  ;;  %p1859_p1 = scmp.eq.s32.totalorder %s1565_s22, 0 }
   0xb   : > { %p168_p3 = scmp.eq.s32.totalorder %s1153_s23, 3  ;;  %p1154_p5 = scmp.ge.s32.totalorder %s1501_s21, 1 }
   0xc   : > { %p1574_p4 = por %p1859_p1, %p44_p0  ;;  %p175_p7 = scmp.lt.s32.totalorder %s1501_s21, 5 }
   0xd   : > { %p1579_p6 = por %p168_p3, %p44_p0  ;;  %s1503_s27 = smov [#allocation7]  }
   0xe   : > { %s1864_s24 = scalar_select %p1574_p4, 1, 0 }
   0xf   : > { %s1865_s25 = scalar_select %p1579_p6, 1, 0 }
  0x10   : > { %p1584_p8 = pnand %p1154_p5, %p175_p7  ;;  %s187_s28 = sshll.u32 %s1503_s27, 4  ;;  %s188_s28 = int_to_ptr.vmem [resolvable:$true] %s187_s28 }
  0x11   : > { %s1597_s30 = sadd.s32 1, %s1501_s21   ;;  %s31_s6 = sadd.s32 1, %s1497_s20 }
  0x12   : > { %s1866_s26 = scalar_select %p1584_p8, 1, 0 }
  0x13   : > { %p1250_p9 = pneg %p1584_p8  ;;  %s28_s7 = ssub.s32 %s1501_s21, %s1597_s30 }
  0x14   : > { %s1339_s10 = scalar_lea.hbm %s1856_s3, 3072 }
  0x15   : > { %p1592_p10 = pnand %p1250_p9, %p1859_p1  ;;  %p1340_p11 = scmp.ne.s32.totalorder %s1856_s3, %s1339_s10 }
  0x16   : > { %p1346_p3 = scmp.lt.u32.totalorder %s1339_s10, %s1856_s3 }
  0x17   : > { %p1341_p12 = pneg %p1592_p10 }
  0x19   : > { %p1342_p13 = pnand %p1341_p12, %p1340_p11 }
  0x1b   : > { %p1343_p0 = pneg %p1342_p13 }
  0x1d   : > { %p1348_p5 = pnand %p1346_p3, %p1343_p0 }
  0x1f   : > { %1351 = shalt.err (!%p1348_p5)
}
  0x20   : > { %s1352_s15 = scalar_lea.vmem %s188_s28, 3072  ;;  %p1360_p2 = scmp.lt.s32.totalorder %s188_s28, %s188_s28 }
  0x21   : > { %p1353_p7 = scmp.ne.s32.totalorder %s188_s28, %s1352_s15  ;;  %p1361_p6 = scmp.lt.s32.totalorder %s1352_s15, %s1352_s15 }
  0x23   : > { %p1355_p9 = pnand %p1353_p7, %p1341_p12  ;;  %p1362_p4 = por %p1361_p6, %p1360_p2 }
  0x25   : > { %p1356_p1 = pneg %p1355_p9 }
  0x27   : > { %p1363_p8 = pnand %p1362_p4, %p1356_p1 }
  0x29   : > { %1366 = shalt.err (!%p1363_p8)
}
  0x2a   : > { %s1504_s16 = smov 256   ;;  %s1505_s17 = smov 16  }
  0x2b   : > { %1253 = dma.hbm_to_vmem [thread:$0]  (!%p1592_p10), %s1856_s3, 3072, %s188_s28, [#allocation6], %s1504_s16, %s1504_s16, %s1505_s17  }
  0x2c   : > { %p29_p2 = scmp.eq.s32.totalorder %s28_s7, 0  ;;  %p38_p1 = scmp.ne.s32.totalorder %s1497_s20, %s1493_s19 }
  0x2d   : > { %p39_p4 = scmp.eq.s32.totalorder %s1501_s21, 0  ;;  %p1266_p6 = scmp.lt.s32.totalorder %s1501_s21, 4 }
  0x2e   : > { %s1623_s8 = scalar_select %p29_p2, %s1497_s20, %s31_s6  }
  0x2f   : > { %p40_p8 = por %p39_p4, %p38_p1  ;;  %p1868_p11 = scmp.eq.s32.totalorder %s1565_s22, 3 }
  0x30   : > { %s1632_s10 = sand.u32 1, %s1497_s20   ;;  %s1158_s29 = sshll.u32 %s1501_s21, 7 }
  0x31   : > { %p1627_p12 = por %p1868_p11, %p38_p1  ;;  %s1157_s11 = sshll.u32 %s1632_s10, 3 }
  0x32   : > { %s1870_s0 = sld [smem:[#allocation13_spill]]  ;;  %s208_s6 = scalar_lea.vmem [#allocation2], %s1157_s11 }
  0x33   : > { %s1869_s9 = scalar_select %p1627_p12, 1, 0 }
  0x34   : > { %s215_s13 = sshll.u32 %s208_s6, 4  ;;  %p1641_p10 = pnand %p1266_p6, %p40_p8  ;;  %s1645_s13 = int_to_ptr.vmem [resolvable:$true] %s215_s13 }
  0x35   : > { %s222_s15 = sand.u32 1, %s1501_s21   ;;  %s205_s16 = scalar_lea.sflag [#allocation3], %s1632_s10 }
  0x36   : > { %p1369_p0 = pneg %p1641_p10 }
  0x38   : > { %s1639_s7 = scalar_lea.hbm %s1870_s0, %s1158_s29  ;;  %s1372_s29 = scalar_lea.hbm %s1870_s0, 512 }
  0x39   : > { %s1367_s17 = scalar_lea.hbm %s1639_s7, 128  ;;  %p1373_p7 = scmp.lt.u32.totalorder %s1639_s7, %s1870_s0 }
  0x3a   : > { %p1368_p13 = scmp.ne.s32.totalorder %s1639_s7, %s1367_s17  ;;  %p1374_p9 = scmp.lt.u32.totalorder %s1372_s29, %s1367_s17 }
  0x3b   : > { %p1376_p1 = scmp.lt.u32.totalorder %s1367_s17, %s1639_s7 }
  0x3c   : > { %p1370_p3 = pnand %p1369_p0, %p1368_p13  ;;  %p1375_p2 = por %p1374_p9, %p1373_p7 }
  0x3e   : > { %p1371_p5 = pneg %p1370_p3  ;;  %p1377_p4 = por %p1376_p1, %p1375_p2 }
  0x40   : > { %p1378_p6 = pnand %p1377_p4, %p1371_p5 }
  0x42   : > { %1381 = shalt.err (!%p1378_p6)
}
  0x43   : > { %s1382_s12 = scalar_lea.vmem %s1645_s13, 128  ;;  %s1506_s6 = smov [#allocation2]  }
  0x44   : > { %p1383_p8 = scmp.ne.s32.totalorder %s1645_s13, %s1382_s12  ;;  %s1387_s23 = sshll.u32 %s1506_s6, 4  ;;  %s1388_s23 = int_to_ptr.vmem [resolvable:$false] %s1387_s23 }
  0x45   : > { %s1389_s27 = scalar_lea.vmem %s1388_s23, 256  ;;  %p1390_p3 = scmp.lt.s32.totalorder %s1645_s13, %s1388_s23 }
  0x46   : > { %p1385_p11 = pnand %p1383_p8, %p1369_p0  ;;  %p1391_p7 = scmp.lt.s32.totalorder %s1389_s27, %s1382_s12 }
  0x48   : > { %p1386_p13 = pneg %p1385_p11  ;;  %p1392_p9 = por %p1391_p7, %p1390_p3 }
  0x4a   : > { %p1393_p2 = pnand %p1392_p9, %p1386_p13 }
  0x4c   : > { %1396 = shalt.err (!%p1393_p2)
}
  0x4d   : > { %1257 = dma.hbm_to_vmem [thread:$0]  (!%p1641_p10), %s1639_s7, 128, %s1645_s13, %s205_s16  }
  0x4e   : > { %s1159_s17 = sshll.u32 %s1632_s10, 1  ;;  %s1160_s29 = sshll.u32 %s1501_s21, 5 }
  0x4f   : > { %s1679_s6 = scalar_lea.hbm %s1854_s1, %s1160_s29  ;;  %s226_s12 = scalar_lea.vmem [#allocation5], %s1159_s17 }
  0x50   : > { %s233_s23 = sshll.u32 %s226_s12, 4  ;;  %s223_s27 = scalar_lea.sflag [#allocation6], %s222_s15  ;;  %s234_s23 = int_to_ptr.vmem [resolvable:$true] %s233_s23 }
  0x51   : > { %s1397_s0 = scalar_lea.hbm %s1679_s6, 32  ;;  %s1402_s13 = scalar_lea.hbm %s1854_s1, 128 }
  0x52   : > { %p1398_p5 = scmp.ne.s32.totalorder %s1679_s6, %s1397_s0  ;;  %p1403_p6 = scmp.lt.u32.totalorder %s1679_s6, %s1854_s1 }
  0x53   : > { %p1404_p8 = scmp.lt.u32.totalorder %s1402_s13, %s1397_s0  ;;  %p1406_p13 = scmp.lt.u32.totalorder %s1397_s0, %s1679_s6 }
  0x54   : > { %p1400_p1 = pnand %p1398_p5, %p1369_p0 }
  0x55   : > { %p1405_p11 = por %p1404_p8, %p1403_p6 }
  0x56   : > { %p1401_p4 = pneg %p1400_p1 }
  0x57   : > { %p1407_p3 = por %p1406_p13, %p1405_p11 }
  0x59   : > { %p1408_p7 = pnand %p1407_p3, %p1401_p4 }
  0x5b   : > { %1411 = shalt.err (!%p1408_p7)
}
  0x5c   : > { %s1412_s15 = scalar_lea.vmem %s234_s23, 32  ;;  %s1507_s17 = smov [#allocation5]  }
  0x5d   : > { %p1413_p9 = scmp.ne.s32.totalorder %s234_s23, %s1412_s15  ;;  %s1417_s11 = sshll.u32 %s1507_s17, 4  ;;  %s1418_s11 = int_to_ptr.vmem [resolvable:$false] %s1417_s11 }
  0x5e   : > { %s1419_s28 = scalar_lea.vmem %s1418_s11, 64  ;;  %p1420_p1 = scmp.lt.s32.totalorder %s234_s23, %s1418_s11 }
  0x5f   : > { %p1415_p2 = pnand %p1413_p9, %p1369_p0  ;;  %p1421_p12 = scmp.lt.s32.totalorder %s1419_s28, %s1412_s15 }
  0x61   : > { %p1416_p5 = pneg %p1415_p2  ;;  %p1422_p6 = por %p1421_p12, %p1420_p1 }
  0x63   : > { %p1423_p8 = pnand %p1422_p6, %p1416_p5 }
  0x65   : > { %1426 = shalt.err (!%p1423_p8)
}
  0x66   : > { %1260 = dma.hbm_to_vmem [thread:$0]  (!%p1641_p10), %s1679_s6, 32, %s234_s23, %s223_s27  }
  0x67   : > { %p1872_p4 = scmp.ne.s32.totalorder %s1866_s26, 0 }
  0x68   : > { %s1705_s0 = sand.u32 (!%p1872_p4), 1, %s1493_s19   ;;  %p1873_p12 = scmp.ne.s32.totalorder (!%p1872_p4), %s1864_s24, 0 }
  0x69   : > { %248 = sbr.rel (%p1872_p4) target bundleno = 2602 (0xa2a), region = 40  ;;  %s1162_s12 = sshll.u32 (!%p1872_p4), %s1705_s0, 3 }
  0x6a   : > { %s251_s10 = scalar_lea.sflag (!%p1872_p4), [#allocation3], %s1705_s0  ;;  %s1711_s7 = scalar_lea.vmem (!%p1872_p4), [#allocation2], %s1162_s12 }
  0x70   : > { %1472 = dma.done.wait (%p1873_p12), %s251_s10, 128  }
  0x71   : > { %1474 = vsyncadd (%p1873_p12), %s251_s10, 4294967168  ;;  %s259_s26 = sand.u32 1, %s1565_s22   ;;  %s1163_s14 = sshll.u32 %s1705_s0, 1 }
  0x72   : > { %s260_s6 = scalar_lea.sflag [#allocation6], %s259_s26  ;;  %s263_s23 = scalar_lea.vmem [#allocation5], %s1163_s14 }
  0x73   : > { %1476 = dma.done.wait (%p1873_p12), %s260_s6, 32  }
  0x74   : > { %1478 = vsyncadd (%p1873_p12), %s260_s6, 4294967264  ;;  %p1874_p10 = scmp.eq.s32.totalorder %s1565_s22, 0 }
  0x76   : > { %1480 = dma.done.wait (%p1874_p10), [#allocation6], 3072   ;;  %p1875_p0 = pmov %p1874_p10 }
  0x77   : > { %v308_v0 = vlaneseq  ;;  %p302_p11 = scmp.lt.s32.totalorder %s1565_s22, 3  ;;  %v1508_v1 = vmov 0.0   ;;  %vm1509_vm0 = vmmov 0   ;;  %v410_v5 = vld [vmem:[#allocation7 + $0x8] sm:$0xff]  ;;  %v412_v6 = vld [vmem:[#allocation7 + $0x18] sm:$0xff]  ;;  %v409_v7 = vld [vmem:[#allocation7] sm:$0xff] }
  0x78   : > { %1482 = vsyncadd (%p1875_p0), [#allocation6], 4294964224  ;;  %1196 = vmatprep.subr.mxu0 %v1508_v1  ;;  %1198 = vmatprep.mubr.msk.f32.mxu0 %vm1509_vm0, %v1508_v1  ;;  %v1216_v8 = vpack.c.bf16 %v412_v6, %v410_v5  ;;  %v411_v9 = vld [vmem:[#allocation7 + $0x10] sm:$0xff]  ;;  %v414_v10 = vld [vmem:[#allocation7 + $0x28] sm:$0xff]  ;;  %vm331_vm1 = vcmask 130048   ;;  %s1510_s17 = smov 64  }
  0x79   : > { %v309_v2 = vshrl.u32 %v308_v0, 7  ;;  %485 = vmatprep.mubr.f32.mxu1 %v1508_v1  ;;  %s303_s24 = scalar_select %p302_p11, %s1565_s22, 3  ;;  %v416_v11 = vld [vmem:[#allocation7 + $0x38] sm:$0xff]  ;;  %v1218_v12 = vpack.c.bf16 %v411_v9, %v409_v7  ;;  %v413_v15 = vld [vmem:[#allocation7 + $0x20] sm:$0xff]  ;;  %v415_v16 = vld [vmem:[#allocation7 + $0x30] sm:$0xff]  ;;  %vm417_vm4 = vcmask 261120  }
  0x7a   : > { %v1220_v13 = vpack.c.bf16 %v416_v11, %v414_v10  ;;  %v306_v14 = vld [vmem:[%s263_s23] sm:$0x3]  ;;  %1217 = vmatprep.subr.bf16.mxu1 %v1216_v8  ;;  %v1739_v19 = vld [vmem:[%s1857_s4] ss:$0 sm:$0xff]  ;;  %v1222_v20 = vpack.c.bf16 %v415_v16, %v413_v15  ;;  %vm492_vm5 = vcmask 64512   ;;  %s1511_s11 = smov 32  }
  0x7b   : > { %v312_v3 = vsub.s32 0, %v309_v2  ;;  %v319_v4 = vsub.s32 1, %v309_v2  ;;  %s304_s16 = scalar_lea.vmem %s1855_s2, %s303_s24  ;;  %1219 = vmatpush1.bf16.msra.mxu1 %v1218_v12  ;;  %597 = vrot.lane.b32.xlu0 %v1739_v19, %s1510_s17  ;;  %v305_v25 = vld [vmem:[%s1711_s7] sm:$0xff]  ;;  %s1512_s28 = smov 96   ;;  %v624_v48 = vld [vmem:[#allocation7 + $0x40] sm:$0xff] }
  0x7c   : > { %v1168_v21 = vld [vmem:[%s304_s16] ss:$0 sm:$0xff]  ;;  %1221 = vmatprep.subr.bf16.mxu1 %v1220_v13  ;;  %v627_v47 = vld [vmem:[#allocation7 + $0x58] sm:$0xff]  ;;  %v626_v50 = vld [vmem:[#allocation7 + $0x50] sm:$0xff]  ;;  %s1185_s10 = sshll.u32 %s1565_s22, 7  ;;  %s301_s7 = scalar_lea.vmem [#allocation8], %s1162_s12 }
  0x7d   : > { %v313_v17 = vrot.slane %v306_v14, %v312_v3  ;;  %v320_v18 = vrot.slane %v306_v14, %v319_v4  ;;  %v625_v46 = vld [vmem:[#allocation7 + $0x48] sm:$0xff]  ;;  %v631_v52 = vld [vmem:[#allocation7 + $0x78] sm:$0xff]  ;;  %v1226_v53 = vpack.c.bf16 %v626_v50, %v624_v48  ;;  %v628_v55 = vld [vmem:[#allocation7 + $0x60] sm:$0xff]  ;;  %s1042_s26 = sshll.u32 %s301_s7, 4  ;;  %s1809_s23 = scalar_lea.hbm %s1858_s5, %s1185_s10  ;;  %s1811_s26 = int_to_ptr.vmem [resolvable:$true] %s1042_s26 }
  0x7e   : > { %v1224_v49 = vpack.c.bf16 %v627_v47, %v625_v46  ;;  %v629_v51 = vld [vmem:[#allocation7 + $0x68] sm:$0xff]  ;;  %v630_v56 = vld [vmem:[#allocation7 + $0x70] sm:$0xff]  ;;  %s1029_s24 = scalar_lea.sflag [#allocation4], %s1705_s0  ;;  %s1427_s27 = scalar_lea.vmem %s1811_s26, 128 }
  0x7f   : > { %vm314_vm2 = vcmp.eq.s32.totalorder %v309_v2, %v313_v17  ;;  %vm321_vm3 = vcmp.eq.s32.totalorder %v309_v2, %v320_v18  ;;  %1223 = vmatpush1.bf16.msra.mxu1 %v1222_v20  ;;  %v1228_v54 = vpack.c.bf16 %v631_v52, %v629_v51  ;;  %v1230_v57 = vpack.c.bf16 %v630_v56, %v628_v55  ;;  %p1428_p13 = scmp.ne.s32.totalorder %s1811_s26, %s1427_s27  ;;  %p1876_p3 = scmp.ne.s32.totalorder %s1869_s9, 0 }
  0x80   : > { %v1166_v22 = vsel %vm314_vm2, 1.0, %v1508_v1  ;;  %v1167_v23 = vsel %vm321_vm3, 1.0, %v1508_v1  ;;  %1206 = vmatprep.subr.mxu1 %v1508_v1  ;;  %s1513_s22 = smov [#allocation8]  }
  0x81   : > { %1197 = vmatpush3.xpose.msk.msra.mxu0 %vm331_vm1, %v1166_v22  ;;  %v330_v24 = vmul.f32 %v1168_v21, %v1167_v23  ;;  %p1429_p7 = pnand %p1428_p13, %p1876_p3  ;;  %s1431_s12 = sshll.u32 %s1513_s22, 4  ;;  %s1432_s12 = int_to_ptr.vmem [resolvable:$false] %s1431_s12 }
  0x82   : > { %1201 = vmatprep.subr.mxu0 %v1508_v1  ;;  %1171 = vmatmul.mubr.msk.f32.vlgmr.msra.gmra.mrb[0].mxu1 %vm417_vm4, %v305_v25  ;;  %s1433_s13 = scalar_lea.vmem %s1432_s12, 256  ;;  %p1434_p2 = scmp.lt.s32.totalorder %s1811_s26, %s1432_s12 }
  0x83   : > { %1208 = vmatprep.mubr.msk.f32.mxu1 %vm1509_vm0, %v1508_v1  ;;  %p1430_p9 = pneg %p1429_p7  ;;  %p1435_p5 = scmp.lt.s32.totalorder %s1433_s13, %s1427_s27 }
  0x84   : > { %1199 = vmatmul.mubr.msk.f32.vlgmr.msra.gmra.mrb[0].mxu0 %vm331_vm1, %v330_v24 }
  0x85   : > { %1203 = vmatprep.mubr.msk.f32.mxu0 %vm1509_vm0, %v1508_v1  ;;  %p1436_p1 = por %p1435_p5, %p1434_p2 }
  0x87   : > { %p1437_p6 = pnand %p1436_p1, %p1430_p9 }
  0xed   : > { %v1757_v27 = vpop.permute.xlu0 %597 }
 0x155   : > { %v487_v28 = vpop.f32.mrb[0].mxu1 }
 0x156   : > { %567 = vrot.lane.b32.xlu0 %v487_v28, %s1511_s11  ;;  %v489_v30 = vpop.f32.mrb[1].mxu1  ;;  %1202 = vmatpush3.msra.mxu0 %v487_v28 }
 0x157   : > { %v1755_v26 = vpop.f32.mrb[0].mxu0  ;;  %v600_v31 = vadd.f32 %v1757_v27, %v489_v30  ;;  %1225 = vmatprep.subr.bf16.mxu0 %v1224_v49 }
 0x158   : > { %v1200_v29 = vpop.f32.mrb[1].mxu0  ;;  %1204 = vmatmul.mubr.msk.f32.vlgmr.msra.gmra.mrb[2].mxu0 %vm492_vm5, %v1755_v26 }
 0x159   : > { %701 = vmatprep.mubr.f32.mxu0 %v1508_v1  ;;  %602 = vrot.lane.b32.xlu1 %v600_v31, %s1512_s28  ;;  %v825_v29 = vld [vmem:[#allocation7 + $0x88] sm:$0xff]  ;;  %v824_v31 = vld [vmem:[#allocation7 + $0x80] sm:$0xff] }
 0x15a   : > { %585 = vrot.lane.b32.xlu0 %v489_v30, %s1511_s11  ;;  %1227 = vmatpush1.bf16.msra.mxu0 %v1226_v53  ;;  %v827_v30 = vld [vmem:[#allocation7 + $0x98] sm:$0xff] }
 0x15b   : > { %1229 = vmatprep.subr.bf16.mxu0 %v1228_v54 }
 0x15e   : > { %618 = vrot.lane.b32.xlu0 %v305_v25, %s1511_s11  ;;  %1231 = vmatpush1.bf16.msra.mxu0 %v1230_v57 }
 0x15f   : > { %1211 = vmatprep.subr.mxu0 %v1508_v1 }
 0x1c8   : > { %v568_v32 = vpop.permute.xlu0 %567 }
 0x1cb   : > { %v603_v41 = vpop.permute.xlu1 %602 }
 0x1cc   : > { %v586_v59 = vpop.permute.xlu0 %585 }
 0x1d0   : > { %v619_v3 = vpop.permute.xlu0 %618 }
 0x22b   : > { %v562_v33 = vpop.f32.mrb[2].mxu0 }
 0x22c   : > { %v570_v34 = vadd.f32 %v568_v32, %v562_v33  ;;  %v1205_v35 = vpop.f32.mrb[3].mxu0  ;;  %v596_v43 = vadd.f32 %v1739_v19, %v562_v33  ;;  %v588_v60 = vadd.f32 %v586_v59, %v562_v33  ;;  %v1232_v32 = vpack.c.bf16 %v827_v30, %v825_v29  ;;  %v826_v33 = vld [vmem:[#allocation7 + $0x90] sm:$0xff] }
 0x22d   : > { %v831_v35 = vld [vmem:[#allocation7 + $0xb8] sm:$0xff] }
 0x22e   : > { %v577_v36 = vadd.f32 %v1739_v19, %v570_v34  ;;  %v589_v61 = vadd.f32 %v1739_v19, %v588_v60  ;;  %v829_v34 = vld [vmem:[#allocation7 + $0xa8] sm:$0xff] }
 0x230   : > { %v1174_v37 = vmul.f32 -1.442695, %v577_v36  ;;  %v1175_v62 = vmul.f32 -1.442695, %v589_v61  ;;  %v1234_v36 = vpack.c.bf16 %v826_v33, %v824_v31 }
 0x232   : > { %1309 = vpow2.f32 %v1174_v37  ;;  %v1236_v37 = vpack.c.bf16 %v831_v35, %v829_v34 }
 0x23c   : > { %v1310_v38 = vpop.eup %1309 }
 0x23d   : > { %v581_v39 = vadd.f32 1.0, %v1310_v38  ;;  %v828_v38 = vld [vmem:[#allocation7 + $0xa0] sm:$0xff] }
 0x23f   : > { %1311 = vrcp.f32 %v581_v39  ;;  %v830_v39 = vld [vmem:[#allocation7 + $0xb0] sm:$0xff] }
 0x249   : > { %v1312_v40 = vpop.eup %1311 }
 0x24a   : > { %v605_v42 = vmul.f32 %v1312_v40, %v603_v41  ;;  %v1238_v40 = vpack.c.bf16 %v830_v39, %v828_v38 }
 0x24c   : > { %607 = vrot.lane.b32.xlu1 %v605_v42, %s1510_s17 }
 0x2be   : > { %v608_v44 = vpop.permute.xlu1 %607 }
 0x2bf   : > { %v610_v45 = vadd.f32 %v608_v44, %v596_v43 }
 0x2c1   : > { %1313 = vtanh.f32 %v610_v45 }
 0x2c2   : > { %1315 = vpow2.f32 %v1175_v62 }
 0x2cb   : > { %v1314_v58 = vpop.eup %1313 }
 0x2cc   : > { %614 = vrot.lane.b32.xlu1 %v1314_v58, %s1512_s28  ;;  %v1316_v63 = vpop.eup %1315 }
 0x2cd   : > { %v593_v0 = vadd.f32 1.0, %v1316_v63 }
 0x2cf   : > { %1317 = vrcp.f32 %v593_v0 }
 0x2d9   : > { %v1318_v2 = vpop.eup %1317 }
 0x2da   : > { %v612_v4 = vsub.f32 1.0, %v1318_v2  ;;  %v621_v6 = vmul.f32 %v1318_v2, %v619_v3 }
 0x33e   : > { %v615_v5 = vpop.permute.xlu1 %614 }
 0x33f   : > { %v617_v7 = vmul.f32 %v615_v5, %v612_v4 }
 0x341   : > { %v622_v8 = vadd.f32 %v621_v6, %v617_v7 }
 0x343   : > { %633 = vrot.lane.b32.xlu1 %v622_v8, %s1512_s28 }
 0x3b5   : > { %v634_v9 = vpop.permute.xlu1 %633 }
 0x3b6   : > { %1176 = vmatmul.mubr.msk.f32.vlgmr.msra.gmra.mrb[4].mxu0 %vm417_vm4, %v634_v9 }
 0x3b7   : > { %1213 = vmatprep.mubr.msk.f32.mxu0 %vm1509_vm0, %v1508_v1 }
 0x489   : > { %v703_v10 = vpop.f32.mrb[4].mxu0 }
 0x48a   : > { %779 = vrot.lane.b32.xlu0 %v703_v10, %s1511_s11  ;;  %v705_v11 = vpop.f32.mrb[5].mxu0  ;;  %1207 = vmatpush3.msra.mxu1 %v703_v10 }
 0x48b   : > { %v803_v12 = vadd.f32 %v705_v11, %v1757_v27  ;;  %1209 = vmatmul.mubr.msk.f32.vlgmr.msra.gmra.mrb[2].mxu1 %vm492_vm5, %v1755_v26  ;;  %1233 = vmatprep.subr.bf16.mxu1 %v1232_v32 }
 0x48c   : > { %901 = vmatprep.mubr.f32.mxu1 %v1508_v1  ;;  %1235 = vmatpush1.bf16.msra.mxu1 %v1234_v36 }
 0x48d   : > { %805 = vrot.lane.b32.xlu1 %v803_v12, %s1512_s28  ;;  %1237 = vmatprep.subr.bf16.mxu1 %v1236_v37 }
 0x490   : > { %1239 = vmatpush1.bf16.msra.mxu1 %v1238_v40 }
 0x491   : > { %791 = vrot.lane.b32.xlu1 %v705_v11, %s1511_s11 }
 0x4fc   : > { %v780_v13 = vpop.permute.xlu0 %779 }
 0x4ff   : > { %v806_v23 = vpop.permute.xlu1 %805 }
 0x503   : > { %v792_v42 = vpop.permute.xlu1 %791 }
 0x55e   : > { %v774_v14 = vpop.f32.mrb[2].mxu1 }
 0x55f   : > { %v782_v15 = vadd.f32 %v780_v13, %v774_v14  ;;  %v1210_v16 = vpop.f32.mrb[3].mxu1  ;;  %v802_v1 = vadd.f32 %v1739_v19, %v774_v14  ;;  %v794_v43 = vadd.f32 %v792_v42, %v774_v14 }
 0x561   : > { %v783_v17 = vadd.f32 %v1739_v19, %v782_v15  ;;  %v795_v44 = vadd.f32 %v1739_v19, %v794_v43 }
 0x563   : > { %v1178_v18 = vmul.f32 -1.442695, %v783_v17  ;;  %v1179_v45 = vmul.f32 -1.442695, %v795_v44 }
 0x565   : > { %1319 = vpow2.f32 %v1178_v18 }
 0x56f   : > { %v1320_v20 = vpop.eup %1319 }
 0x570   : > { %v787_v21 = vadd.f32 1.0, %v1320_v20 }
 0x572   : > { %1321 = vrcp.f32 %v787_v21 }
 0x57c   : > { %v1322_v22 = vpop.eup %1321 }
 0x57d   : > { %v808_v24 = vmul.f32 %v1322_v22, %v806_v23 }
 0x57f   : > { %810 = vrot.lane.b32.xlu0 %v808_v24, %s1510_s17 }
 0x5f1   : > { %v811_v25 = vpop.permute.xlu0 %810 }
 0x5f2   : > { %v813_v28 = vadd.f32 %v811_v25, %v802_v1 }
 0x5f4   : > { %1323 = vtanh.f32 %v813_v28 }
 0x5f5   : > { %1325 = vpow2.f32 %v1179_v45 }
 0x5fe   : > { %v1324_v41 = vpop.eup %1323 }
 0x5ff   : > { %817 = vrot.lane.b32.xlu0 %v1324_v41, %s1512_s28  ;;  %v1326_v46 = vpop.eup %1325 }
 0x600   : > { %v799_v47 = vadd.f32 1.0, %v1326_v46 }
 0x602   : > { %1327 = vrcp.f32 %v799_v47 }
 0x60c   : > { %v1328_v48 = vpop.eup %1327 }
 0x60d   : > { %v815_v49 = vsub.f32 1.0, %v1328_v48  ;;  %v821_v52 = vmul.f32 %v1328_v48, %v622_v8 }
 0x671   : > { %v818_v50 = vpop.permute.xlu0 %817 }
 0x672   : > { %v820_v51 = vmul.f32 %v818_v50, %v815_v49 }
 0x674   : > { %v822_v53 = vadd.f32 %v821_v52, %v820_v51 }
 0x676   : > { %833 = vrot.lane.b32.xlu1 %v822_v53, %s1512_s28 }
 0x6e8   : > { %v834_v54 = vpop.permute.xlu1 %833 }
 0x6e9   : > { %1180 = vmatmul.mubr.msk.f32.vlgmr.msra.gmra.mrb[4].mxu1 %vm417_vm4, %v834_v54 }
 0x7bc   : > { %v903_v55 = vpop.f32.mrb[4].mxu1 }
 0x7bd   : > { %979 = vrot.lane.b32.xlu0 %v903_v55, %s1511_s11  ;;  %v905_v56 = vpop.f32.mrb[5].mxu1  ;;  %1212 = vmatpush3.msra.mxu0 %v903_v55 }
 0x7be   : > { %v1003_v57 = vadd.f32 %v905_v56, %v1757_v27  ;;  %1214 = vmatmul.mubr.msk.f32.vlgmr.msra.gmra.mrb[6].mxu0 %vm492_vm5, %v1755_v26 }
 0x7c0   : > { %1005 = vrot.lane.b32.xlu1 %v1003_v57, %s1512_s28 }
 0x7c4   : > { %991 = vrot.lane.b32.xlu1 %v905_v56, %s1511_s11 }
 0x82f   : > { %v980_v58 = vpop.permute.xlu0 %979 }
 0x832   : > { %v1006_v27 = vpop.permute.xlu1 %1005 }
 0x836   : > { %v992_v8 = vpop.permute.xlu1 %991 }
 0x891   : > { %v974_v59 = vpop.f32.mrb[6].mxu0 }
 0x892   : > { %v982_v60 = vadd.f32 %v980_v58, %v974_v59  ;;  %v1215_v61 = vpop.f32.mrb[7].mxu0  ;;  %v1002_v26 = vadd.f32 %v1739_v19, %v974_v59  ;;  %v994_v9 = vadd.f32 %v992_v8, %v974_v59 }
 0x894   : > { %v983_v62 = vadd.f32 %v1739_v19, %v982_v60  ;;  %v995_v10 = vadd.f32 %v1739_v19, %v994_v9 }
 0x896   : > { %v1182_v63 = vmul.f32 -1.442695, %v983_v62  ;;  %v1183_v11 = vmul.f32 -1.442695, %v995_v10 }
 0x898   : > { %1329 = vpow2.f32 %v1182_v63 }
 0x8a2   : > { %v1330_v0 = vpop.eup %1329 }
 0x8a3   : > { %v987_v2 = vadd.f32 1.0, %v1330_v0 }
 0x8a5   : > { %1331 = vrcp.f32 %v987_v2 }
 0x8af   : > { %v1332_v3 = vpop.eup %1331 }
 0x8b0   : > { %v1008_v4 = vmul.f32 %v1332_v3, %v1006_v27 }
 0x8b2   : > { %1010 = vrot.lane.b32.xlu0 %v1008_v4, %s1510_s17 }
 0x924   : > { %v1011_v5 = vpop.permute.xlu0 %1010 }
 0x925   : > { %v1013_v6 = vadd.f32 %v1011_v5, %v1002_v26 }
 0x927   : > { %1333 = vtanh.f32 %v1013_v6 }
 0x928   : > { %1335 = vpow2.f32 %v1183_v11 }
 0x931   : > { %v1334_v7 = vpop.eup %1333 }
 0x932   : > { %1017 = vrot.lane.b32.xlu0 %v1334_v7, %s1512_s28  ;;  %v1336_v12 = vpop.eup %1335 }
 0x933   : > { %v999_v13 = vadd.f32 1.0, %v1336_v12 }
 0x935   : > { %1337 = vrcp.f32 %v999_v13 }
 0x93f   : > { %v1338_v14 = vpop.eup %1337 }
 0x940   : > { %v1015_v15 = vsub.f32 1.0, %v1338_v14  ;;  %v1021_v18 = vmul.f32 %v1338_v14, %v822_v53 }
 0x9a4   : > { %v1018_v16 = vpop.permute.xlu0 %1017 }
 0x9a5   : > { %v1020_v17 = vmul.f32 %v1018_v16, %v1015_v15 }
 0x9a7   : > { %v1022_v20 = vadd.f32 %v1021_v18, %v1020_v17 }
 0x9a9   : > { %1024 = vrot.lane.b32.xlu1 %v1022_v20, %s1512_s28 }
 0xa1b   : > { %v1025_v19 = vpop.permute.xlu1 %1024 }
 0xa1c   : > { %1027 = vst.msk [vmem:[%s301_s7] sm:$0xff] %vm417_vm4, %v1025_v19 }
 0xa1d   : > { %1440 = shalt.err (!%p1437_p6)
}
 0xa1e   : > { %s1441_s0 = scalar_lea.hbm %s1809_s23, 128  ;;  %s1445_s15 = scalar_lea.hbm %s1858_s5, 512 }
 0xa1f   : > { %p1442_p8 = scmp.ne.s32.totalorder %s1809_s23, %s1441_s0  ;;  %p1446_p10 = scmp.lt.u32.totalorder %s1809_s23, %s1858_s5 }
 0xa20   : > { %p1447_p0 = scmp.lt.u32.totalorder %s1445_s15, %s1441_s0  ;;  %p1449_p13 = scmp.lt.u32.totalorder %s1441_s0, %s1809_s23 }
 0xa21   : > { %p1443_p4 = pnand %p1442_p8, %p1876_p3 }
 0xa22   : > { %p1448_p11 = por %p1447_p0, %p1446_p10 }
 0xa23   : > { %p1444_p12 = pneg %p1443_p4 }
 0xa24   : > { %p1450_p7 = por %p1449_p13, %p1448_p11 }
 0xa26   : > { %p1451_p9 = pnand %p1450_p7, %p1444_p12 }
 0xa28   : > { %1454 = shalt.err (!%p1451_p9)
}
 0xa29   : > { %1248 = dma.vmem_to_hbm [thread:$0]  (%p1876_p3), %s1811_s26, 128, %s1809_s23, %s1029_s24  }
 0xa2a PF: > { %p1268_p2 = scmp.ge.s32.totalorder %s1501_s21, 2  ;;  %s1054_s28 = sand.u32 1, %s1489_s18  }
 0xa2b   : > { %p1877_p5 = scmp.ne.s32.totalorder %s1865_s25, 0  ;;  %s1055_s10 = scalar_lea.sflag [#allocation4], %s1054_s28 }
 0xa2d   : > { %p1262_p1 = pnand %p1268_p2, %p1877_p5 }
 0xa2f   : > { %1484 = dma.done.wait (!%p1262_p1), %s1055_s10, 128  }
 0xa30   : > { %1486 = vsyncadd (!%p1262_p1), %s1055_s10, 4294967168  ;;  %p21_p6 = scmp.ge.s32.totalorder %s1597_s30, 6   ;;  %s1878_s18 = smov %s1493_s19 }
 0xa31   : > { %s1879_s19 = smov %s1497_s20  ;;  %s1880_s20 = smov %s1623_s8 }
 0xa32   : > { %s1881_s21 = smov %s1597_s30  ;;  %23 = sbr.rel (!%p21_p6) target bundleno = 9 (0x9), region = 107 }
 0xa39   :  { %1060 = vsyncpa [#allocation3], 1 }
 0xa3a   :  { %1062 = vsyncpa [#allocation3 + $0x1], 1 }
 0xa3b   :  { %1063 = vsyncpa [#allocation6], 1 }
 0xa3c   :  { %1065 = vsyncpa [#allocation6 + $0x1], 1 }
 0xa3d   :  { %1066 = vsyncpa [#allocation4], 1 }
 0xa3e   :  { %1068 = vsyncpa [#allocation4 + $0x1], 1 }

</bundles_post_ra>
